<compile_context>
chip_gen: v6e
topology: v6e:2x2x1
jax: 0.10.0
libtpu: 0.0.40
codegen_flags: <defaults>
</compile_context>

<pallas_src>
import jax
import jax.numpy as jnp
from jax.experimental import pallas as pl
from jax.experimental.pallas import tpu as pltpu


def _round_up(n, m):
    return ((n + m - 1) // m) * m


def _choose_tb(b, block_rows):
    """Per-grid-step row-block size: multiple of 8, or == b for tiny batches."""
    if b <= 8:
        return b                              # single block == full batch dim
    br = max(8, (block_rows // 8) * 8)        # enforce sublane multiple-of-8
    tb = min(br, _round_up(b, 8))
    # keep >= 2 grid steps so dimension_semantics=("parallel",) can shard the
    # batch across both TensorCores on v7x even for small/medium batches
    tb = min(tb, _round_up((b + 1) // 2, 8))
    return tb


def mlp_logsoftmax_kernel(x_ref, w1_ref, b1_ref, w2_ref, b2_ref, w3_ref, b3_ref, o_ref):
    x = x_ref[...]

    # hidden layer 1: Linear + ReLU (MXU matmul, f32 accumulate)
    h1 = jnp.dot(x, w1_ref[...], preferred_element_type=jnp.float32) + b1_ref[...]
    h1 = jnp.maximum(h1, 0.0)

    # hidden layer 2: Linear + ReLU
    h2 = jnp.dot(h1, w2_ref[...], preferred_element_type=jnp.float32) + b2_ref[...]
    h2 = jnp.maximum(h2, 0.0)

    # output layer: Linear (compact out_size columns, no lane padding)
    logits = jnp.dot(h2, w3_ref[...], preferred_element_type=jnp.float32) + b3_ref[...]

    # numerically-stable log_softmax along the last axis
    m = jnp.max(logits, axis=-1, keepdims=True)
    shifted = logits - m
    lse = jnp.log(jnp.sum(jnp.exp(shifted), axis=-1, keepdims=True))
    o_ref[...] = (shifted - lse).astype(o_ref.dtype)


def net_forward(x, params, *, block_rows=2048):
    """x: (batch, ...) flattened to (batch, in_size). Returns (batch, out_size) log-probs."""
    b = x.shape[0]
    x2d = x.reshape(b, -1).astype(jnp.float32)
    in_size = x2d.shape[1]

    (w1, b1), (w2, b2), (w3, b3) = params
    h1s = w1.shape[1]
    h2s = w2.shape[1]
    out_size = w3.shape[1]

    tb = _choose_tb(b, block_rows)
    grid = (pl.cdiv(b, tb),)   # partial tail block handled by Pallas write masking

    def resident(shape):
        # constant index_map -> loaded once, VMEM-resident across the whole grid
        return pl.BlockSpec(shape, lambda i: (0, 0))

    return pl.pallas_call(
        mlp_logsoftmax_kernel,
        out_shape=jax.ShapeDtypeStruct((b, out_size), jnp.float32),
        grid=grid,
        in_specs=[
            pl.BlockSpec((tb, in_size), lambda i: (i, 0)),   # streamed activations
            resident((in_size, h1s)), resident((1, h1s)),    # layer 1 (resident)
            resident((h1s, h2s)), resident((1, h2s)),        # layer 2 (resident)
            resident((h2s, out_size)), resident((1, out_size)),  # layer 3 (resident)
        ],
        out_specs=pl.BlockSpec((tb, out_size), lambda i: (i, 0)),  # compact output
        compiler_params=pltpu.CompilerParams(
            dimension_semantics=("parallel",)),   # megacore sharding on v7x
    )(x2d,
      w1.astype(jnp.float32), b1.astype(jnp.float32),
      w2.astype(jnp.float32), b2.astype(jnp.float32),
      w3.astype(jnp.float32), b3.astype(jnp.float32))


def init_params(key, in_size=10, out_size=10, n_hidden=2, hidden_size=25):
    """Deterministic init mimicking nn.Linear's U(-1/sqrt(fan_in), 1/sqrt(fan_in)).

    Weights are stored pre-transposed as (in, out) so the kernel computes
    y = x @ W + b (same math as torch's x @ W.T + b).
    """
    sizes = [in_size] + [hidden_size] * n_hidden + [out_size]
    params = []
    for s_in, s_out in zip(sizes[:-1], sizes[1:]):
        key, kw, kb = jax.random.split(key, 3)
        bound = 1.0 / (s_in ** 0.5)
        w = jax.random.uniform(kw, (s_in, s_out), jnp.float32, -bound, bound)
        bias = jax.random.uniform(kb, (1, s_out), jnp.float32, -bound, bound)
        params.append((w, bias))
    return params


def reference_forward(x, params):
    b = x.shape[0]
    h = x.reshape(b, -1).astype(jnp.float32)
    (w1, b1), (w2, b2), (w3, b3) = params
    h = jnp.maximum(h @ w1 + b1, 0.0)
    h = jnp.maximum(h @ w2 + b2, 0.0)
    logits = h @ w3 + b3
    return jax.nn.log_softmax(logits, axis=1)


if __name__ == "__main__":
    key = jax.random.PRNGKey(0)
    kx, kp = jax.random.split(key)

    batch, in_size = 200, 10
    # arbitrary trailing shape; the module flattens with view(batch, -1)
    x = jax.random.normal(kx, (batch, 2, 5), jnp.float32)

    params = init_params(kp, in_size=in_size, out_size=10, n_hidden=2, hidden_size=25)
    ref = reference_forward(x, params)

    # default block size: grid=(2,) with a partial tail block (no wrapper pad/slice)
    out = jax.block_until_ready(net_forward(x, params))
    assert out.shape == (batch, 10)
    assert jnp.allclose(out, ref, atol=1e-5, rtol=1e-5)

    # small block size: exercises grid=(4,) + partial tail block path as well
    out_small = jax.block_until_ready(net_forward(x, params, block_rows=64))
    assert jnp.allclose(out_small, ref, atol=1e-5, rtol=1e-5)

    print("KERNEL_OK")
</pallas_src>

<mosaic_0001>
module attributes {stable_mosaic.version = 11 : i64} {
  func.func @mlp_logsoftmax_kernel(%arg0: i32, %arg1: memref<104x10xf32, #tpu.memory_space<vmem>>, %arg2: memref<10x25xf32, #tpu.memory_space<vmem>>, %arg3: memref<1x25xf32, #tpu.memory_space<vmem>>, %arg4: memref<25x25xf32, #tpu.memory_space<vmem>>, %arg5: memref<1x25xf32, #tpu.memory_space<vmem>>, %arg6: memref<25x10xf32, #tpu.memory_space<vmem>>, %arg7: memref<1x10xf32, #tpu.memory_space<vmem>>, %arg8: memref<104x10xf32, #tpu.memory_space<vmem>>) attributes {dimension_semantics = [#tpu.dimension_semantics<parallel>], iteration_bounds = array<i64: 2>, scalar_prefetch = 0 : i64, scratch_operands = 0 : i64, tpu.core_type = #tpu.core_type<tc>, window_params = [{transform_indices = @transform_0, window_bounds = array<i64: 104, 10>}, {pipeline_mode = #tpu.pipeline_mode<synchronous>, transform_indices = @transform_1, window_bounds = array<i64: 10, 25>}, {pipeline_mode = #tpu.pipeline_mode<synchronous>, transform_indices = @transform_2, window_bounds = array<i64: 1, 25>}, {pipeline_mode = #tpu.pipeline_mode<synchronous>, transform_indices = @transform_3, window_bounds = array<i64: 25, 25>}, {pipeline_mode = #tpu.pipeline_mode<synchronous>, transform_indices = @transform_4, window_bounds = array<i64: 1, 25>}, {pipeline_mode = #tpu.pipeline_mode<synchronous>, transform_indices = @transform_5, window_bounds = array<i64: 25, 10>}, {pipeline_mode = #tpu.pipeline_mode<synchronous>, transform_indices = @transform_6, window_bounds = array<i64: 1, 10>}, {transform_indices = @transform_7, window_bounds = array<i64: 104, 10>}]} {
    %c0 = arith.constant 0 : index
    %c0_0 = arith.constant 0 : index
    %0 = vector.load %arg1[%c0, %c0_0] : memref<104x10xf32, #tpu.memory_space<vmem>>, vector<104x10xf32>
    %c0_1 = arith.constant 0 : index
    %c0_2 = arith.constant 0 : index
    %1 = vector.load %arg2[%c0_1, %c0_2] : memref<10x25xf32, #tpu.memory_space<vmem>>, vector<10x25xf32>
    %cst = arith.constant dense<0.000000e+00> : vector<104x25xf32>
    %2 = tpu.matmul %0, %1, %cst {dimension_numbers = #tpu.dot_dimension_numbers<[1], [0], [0], [1], [0, 0, 1, 1], [], []>} : vector<104x10xf32>, vector<10x25xf32>, vector<104x25xf32> -> vector<104x25xf32>
    %c0_3 = arith.constant 0 : index
    %c0_4 = arith.constant 0 : index
    %3 = vector.load %arg3[%c0_3, %c0_4] : memref<1x25xf32, #tpu.memory_space<vmem>>, vector<1x25xf32>
    %4 = vector.broadcast %3 : vector<1x25xf32> to vector<104x25xf32>
    %5 = arith.addf %2, %4 : vector<104x25xf32>
    %cst_5 = arith.constant 0.000000e+00 : f32
    %6 = vector.broadcast %cst_5 : f32 to vector<104x25xf32>
    %7 = arith.maximumf %5, %6 : vector<104x25xf32>
    %c0_6 = arith.constant 0 : index
    %c0_7 = arith.constant 0 : index
    %8 = vector.load %arg4[%c0_6, %c0_7] : memref<25x25xf32, #tpu.memory_space<vmem>>, vector<25x25xf32>
    %cst_8 = arith.constant dense<0.000000e+00> : vector<104x25xf32>
    %9 = tpu.matmul %7, %8, %cst_8 {dimension_numbers = #tpu.dot_dimension_numbers<[1], [0], [0], [1], [0, 0, 1, 1], [], []>} : vector<104x25xf32>, vector<25x25xf32>, vector<104x25xf32> -> vector<104x25xf32>
    %c0_9 = arith.constant 0 : index
    %c0_10 = arith.constant 0 : index
    %10 = vector.load %arg5[%c0_9, %c0_10] : memref<1x25xf32, #tpu.memory_space<vmem>>, vector<1x25xf32>
    %11 = vector.broadcast %10 : vector<1x25xf32> to vector<104x25xf32>
    %12 = arith.addf %9, %11 : vector<104x25xf32>
    %cst_11 = arith.constant 0.000000e+00 : f32
    %13 = vector.broadcast %cst_11 : f32 to vector<104x25xf32>
    %14 = arith.maximumf %12, %13 : vector<104x25xf32>
    %c0_12 = arith.constant 0 : index
    %c0_13 = arith.constant 0 : index
    %15 = vector.load %arg6[%c0_12, %c0_13] : memref<25x10xf32, #tpu.memory_space<vmem>>, vector<25x10xf32>
    %cst_14 = arith.constant dense<0.000000e+00> : vector<104x10xf32>
    %16 = tpu.matmul %14, %15, %cst_14 {dimension_numbers = #tpu.dot_dimension_numbers<[1], [0], [0], [1], [0, 0, 1, 1], [], []>} : vector<104x25xf32>, vector<25x10xf32>, vector<104x10xf32> -> vector<104x10xf32>
    %c0_15 = arith.constant 0 : index
    %c0_16 = arith.constant 0 : index
    %17 = vector.load %arg7[%c0_15, %c0_16] : memref<1x10xf32, #tpu.memory_space<vmem>>, vector<1x10xf32>
    %18 = vector.broadcast %17 : vector<1x10xf32> to vector<104x10xf32>
    %19 = arith.addf %16, %18 : vector<104x10xf32>
    %cst_17 = arith.constant dense<0xFF800000> : vector<104xf32>
    %20 = vector.multi_reduction <maximumf>, %19, %cst_17 [1] : vector<104x10xf32> to vector<104xf32>
    %21 = vector.shape_cast %20 : vector<104xf32> to vector<104x1xf32>
    %22 = vector.broadcast %21 : vector<104x1xf32> to vector<104x10xf32>
    %23 = arith.subf %19, %22 : vector<104x10xf32>
    %24 = math.exp %23 : vector<104x10xf32>
    %cst_18 = arith.constant dense<0.000000e+00> : vector<104xf32>
    %25 = vector.multi_reduction <add>, %24, %cst_18 [1] : vector<104x10xf32> to vector<104xf32>
    %26 = vector.shape_cast %25 : vector<104xf32> to vector<104x1xf32>
    %27 = math.log %26 : vector<104x1xf32>
    %28 = vector.broadcast %27 : vector<104x1xf32> to vector<104x10xf32>
    %29 = arith.subf %23, %28 : vector<104x10xf32>
    %c0_19 = arith.constant 0 : index
    %c0_20 = arith.constant 0 : index
    %30 = vector.load %arg8[%c0_19, %c0_20] : memref<104x10xf32, #tpu.memory_space<vmem>>, vector<104x10xf32>
    tpu.vector_store %arg8[%c0_19, %c0_20], %29 {strides = array<i32>} : memref<104x10xf32, #tpu.memory_space<vmem>>, vector<104x10xf32>,
    return
  }
  func.func @transform_0(%arg0: i32) -> (i32, i32) {
    %c0_i32 = arith.constant 0 : i32
    %c0_i32_0 = arith.constant 0 : i32
    return %arg0, %c0_i32 : i32, i32
  }
  func.func @transform_1(%arg0: i32) -> (i32, i32) {
    %c0_i32 = arith.constant 0 : i32
    %c0_i32_0 = arith.constant 0 : i32
    %c0_i32_1 = arith.constant 0 : i32
    return %c0_i32, %c0_i32_0 : i32, i32
  }
  func.func @transform_2(%arg0: i32) -> (i32, i32) {
    %c0_i32 = arith.constant 0 : i32
    %c0_i32_0 = arith.constant 0 : i32
    %c0_i32_1 = arith.constant 0 : i32
    return %c0_i32, %c0_i32_0 : i32, i32
  }
  func.func @transform_3(%arg0: i32) -> (i32, i32) {
    %c0_i32 = arith.constant 0 : i32
    %c0_i32_0 = arith.constant 0 : i32
    %c0_i32_1 = arith.constant 0 : i32
    return %c0_i32, %c0_i32_0 : i32, i32
  }
  func.func @transform_4(%arg0: i32) -> (i32, i32) {
    %c0_i32 = arith.constant 0 : i32
    %c0_i32_0 = arith.constant 0 : i32
    %c0_i32_1 = arith.constant 0 : i32
    return %c0_i32, %c0_i32_0 : i32, i32
  }
  func.func @transform_5(%arg0: i32) -> (i32, i32) {
    %c0_i32 = arith.constant 0 : i32
    %c0_i32_0 = arith.constant 0 : i32
    %c0_i32_1 = arith.constant 0 : i32
    return %c0_i32, %c0_i32_0 : i32, i32
  }
  func.func @transform_6(%arg0: i32) -> (i32, i32) {
    %c0_i32 = arith.constant 0 : i32
    %c0_i32_0 = arith.constant 0 : i32
    %c0_i32_1 = arith.constant 0 : i32
    return %c0_i32, %c0_i32_0 : i32, i32
  }
  func.func @transform_7(%arg0: i32) -> (i32, i32) {
    %c0_i32 = arith.constant 0 : i32
    %c0_i32_0 = arith.constant 0 : i32
    return %arg0, %c0_i32 : i32, i32
  }
}

</mosaic_0001>

<bundles_post_ra>
// kernel: tpu_custom_call.1
= control target key start
LH: loop header
LB: loop body
LE: loop exit
PB: predicated region body
PF: predicated region fallthrough
CT: control target
= control target key end

     0   :  { %s1856_s24 = smov 0   ;;  %s1858_s25 = smov 0   ;;  %s2348_s0 = inlined_call_operand.vmem [shape: f32[200,10], index: 0, kind: input, shape index: {}]   ;;  %s2349_s1 = inlined_call_operand.vmem [shape: f32[10,25], index: 1, kind: input, shape index: {}]   ;;  %s2350_s2 = inlined_call_operand.vmem [shape: f32[1,25], index: 2, kind: input, shape index: {}]   ;;  %s2351_s3 = inlined_call_operand.vmem [shape: f32[25,25], index: 3, kind: input, shape index: {}]   ;;  %s2352_s4 = inlined_call_operand.vmem [shape: f32[1,25], index: 4, kind: input, shape index: {}]   ;;  %s2353_s5 = inlined_call_operand.vmem [shape: f32[25,10], index: 5, kind: input, shape index: {}]   ;;  %s2354_s6 = inlined_call_operand.vmem [shape: f32[1,10], index: 6, kind: input, shape index: {}]   ;;  %s2355_s7 = inlined_call_operand.vmem [shape: f32[200,10], index: 7, kind: output, shape index: {}]  }
   0x1   :  { %s1860_s26 = smov 0  }
   0x2 LB: > { %s1869_s27 = sadd.s32 4294967295, %s1780_s26   ;;  %s1871_s28 = sadd.s32 1, %s1780_s26   ;;  %s1780_s26 = sphi %s1860_s26, %s2362_s26   ;;  %s1776_s25 = sphi %s1858_s25, %s2361_s25   ;;  %s1772_s24 = sphi %s1856_s24, %s2360_s24  }
   0x3   : > { %s173_s29 = ssub.s32 %s1780_s26, %s1871_s28  ;;  %s176_s30 = sadd.s32 1, %s1776_s25 }
   0x4   : > { %p174_p0 = scmp.eq.s32.totalorder %s173_s29, 0  ;;  %p186_p1 = scmp.ne.s32.totalorder %s1776_s25, %s1772_s24 }
   0x5   : > { %p187_p2 = scmp.eq.s32.totalorder %s1869_s27, 1  ;;  %p1328_p3 = scmp.ge.s32.totalorder %s1780_s26, 1 }
   0x6   : > { %s1879_s8 = scalar_select %p174_p0, %s1776_s25, %s176_s30  }
   0x7   : > { %p1881_p4 = por %p187_p2, %p186_p1  ;;  %p246_p5 = scmp.lt.s32.totalorder %s1780_s26, 3 }
   0x9   : > { %p247_p6 = pnand %p1328_p3, %p246_p5 }
   0xa   : > { %s1895_s14 = smul.u32 (!%p247_p6), 13, %s1869_s27  ;;  %s278_s30 = sand.u32 (!%p247_p6), 1, %s1772_s24  }
   0xb   : > { %250 = sbr.rel (%p247_p6) target bundleno = 1028 (0x404), region = 48 }
   0xc   : > { %p286_p7 = scmp.lt.s32.totalorder (!%p247_p6), %s1895_s14, 24  ;;  %s1578_s10 = smul.u32 (!%p247_p6), 104, %s278_s30 }
   0xe   : > { %s2219_s11 = scalar_lea.vmem (!%p247_p6), [#allocation2], %s1578_s10  }
  0x10   : > { %v314_v0 = vld [vmem:[%s2349_s1 + $0x8] sm:$0x3]  ;;  %vm362_vm0 = vcmask 1041408   ;;  %v1814_v1 = vmov 0.0   ;;  %v313_v2 = vld [vmem:[%s2349_s1] sm:$0xff]  ;;  %vm1815_vm1 = vmmov 0  }
  0x11   : > { %1437 = vmatprep.subr.mxu0 %v1814_v1  ;;  %1441 = vmatprep.mubr.msk.f32.mxu0 %vm1815_vm1, %v1814_v1  ;;  %s287_s15 = scalar_select %p286_p7, %s1895_s14, 24  ;;  %vm322_vm2 = vcmask 80896   ;;  %v512_v4 = vld [vmem:[%s2351_s3 + $0x18] sm:$0x1]  ;;  %vm560_vm3 = vcmask 1040384   ;;  %v511_v7 = vld [vmem:[%s2351_s3 + $0x10] sm:$0xff] }
  0x12   : > { %1438 = vmatpush3.msk.msra.mxu0 %vm362_vm0, %v314_v0  ;;  %1574 = vmatprep.subr.mxu1 %v1814_v1  ;;  %v510_v9 = vld [vmem:[%s2351_s3 + $0x8] sm:$0xff]  ;;  %v509_v11 = vld [vmem:[%s2351_s3] sm:$0xff]  ;;  %v710_v20 = vld [vmem:[%s2353_s5 + $0x18] sm:$0x1]  ;;  %vm520_vm4 = vcmask 203776   ;;  %s1067_s24 = ssub.s32 (%p1881_p4), 25, %s1895_s14 }
  0x13   : > { %1439 = vmatprep.subr.mxu0 %v1814_v1  ;;  %1576 = vmatpush3.msk.msra.mxu1 %vm362_vm0, %v314_v0  ;;  %s1329_s16 = sshll.u32 %s287_s15, 3  ;;  %v709_v21 = vld [vmem:[%s2353_s5 + $0x10] sm:$0xff]  ;;  %v708_v22 = vld [vmem:[%s2353_s5 + $0x8] sm:$0xff]  ;;  %v707_v23 = vld [vmem:[%s2353_s5] sm:$0xff]  ;;  %s1387_s12 = smul.u32 (%p1881_p4), 104, %s1869_s27 }
  0x14   : > { %1440 = vmatpush3.msra.mxu0 %v313_v2  ;;  %1575 = vmatprep.subr.mxu1 %v1814_v1  ;;  %s1909_s19 = scalar_lea.vmem %s2348_s0, %s1329_s16  ;;  %v1998_v24 = vld [vmem:[%s2350_s2] ss:$0 sm:$0xff]  ;;  %p1068_p8 = scmp.lt.s32.totalorder (%p1881_p4), %s1067_s24, 13 }
  0x15   : > { %1577 = vmatpush3.msra.mxu1 %v313_v2  ;;  %1462 = vmatprep.mubr.msk.f32.mxu1 %vm1815_vm1, %v1814_v1  ;;  %v300_v3 = vld [vmem:[%s1909_s19] sm:$0xff]  ;;  %v301_v5 = vld [vmem:[%s1909_s19 + $0x8] sm:$0xff]  ;;  %v307_v6 = vld [vmem:[%s1909_s19 + $0x38] sm:$0xff]  ;;  %s2266_s16 = scalar_lea.vmem (%p1881_p4), %s2355_s7, %s1387_s12  }
  0x16   : > { %1480 = vmatprep.subr.mxu1 %v1814_v1  ;;  %1527 = vmatprep.subr.mxu0 %v1814_v1  ;;  %v308_v8 = vld [vmem:[%s1909_s19 + $0x40] sm:$0xff]  ;;  %v302_v10 = vld [vmem:[%s1909_s19 + $0x10] sm:$0xff]  ;;  %v309_v12 = vld [vmem:[%s1909_s19 + $0x48] sm:$0xff] }
  0x17   : > { %1442 = vmatmul.mubr.msk.f32.vlgmr.msra.gmra.mxu0 %vm322_vm2, %v300_v3  ;;  %1463 = vmatmul.mubr.msk.f32.vlgmr.msra.gmra.mxu1 %vm322_vm2, %v307_v6  ;;  %v303_v13 = vld [vmem:[%s1909_s19 + $0x18] sm:$0xff]  ;;  %v310_v14 = vld [vmem:[%s1909_s19 + $0x50] sm:$0xff]  ;;  %v304_v15 = vld [vmem:[%s1909_s19 + $0x20] sm:$0xff] }
  0x18   : > { %1444 = vmatprep.mubr.msk.f32.mxu0 %vm1815_vm1, %v1814_v1  ;;  %1465 = vmatprep.mubr.msk.f32.mxu1 %vm1815_vm1, %v1814_v1  ;;  %v311_v16 = vld [vmem:[%s1909_s19 + $0x58] sm:$0xff]  ;;  %v305_v17 = vld [vmem:[%s1909_s19 + $0x28] sm:$0xff]  ;;  %v312_v18 = vld [vmem:[%s1909_s19 + $0x60] sm:$0xff] }
  0x19   : > { %1481 = vmatpush3.msk.msra.mxu1 %vm560_vm3, %v512_v4  ;;  %v306_v19 = vld [vmem:[%s1909_s19 + $0x30] sm:$0xff]  ;;  %1528 = vmatpush3.msk.msra.mxu0 %vm560_vm3, %v710_v20 }
  0x1a   : > { %1482 = vmatprep.subr.mxu1 %v1814_v1  ;;  %1529 = vmatprep.subr.mxu0 %v1814_v1 }
  0x1b   : > { %1445 = vmatmul.mubr.msk.f32.gmra.mxu0 %vm322_vm2, %v301_v5  ;;  %1483 = vmatpush3.msra.mxu1 %v511_v7 }
  0x1c   : > { %1447 = vmatprep.mubr.msk.f32.mxu0 %vm1815_vm1, %v1814_v1  ;;  %1466 = vmatmul.mubr.msk.f32.gmra.mxu1 %vm322_vm2, %v308_v8 }
  0x1d   : > { %1484 = vmatprep.subr.mxu1 %v1814_v1  ;;  %1468 = vmatprep.mubr.msk.f32.mxu1 %vm1815_vm1, %v1814_v1 }
  0x1e   : > { %1485 = vmatpush3.msra.mxu1 %v510_v9  ;;  %1530 = vmatpush3.msra.mxu0 %v709_v21 }
  0x1f   : > { %1448 = vmatmul.mubr.msk.f32.gmra.mxu0 %vm322_vm2, %v302_v10  ;;  %1486 = vmatprep.subr.mxu1 %v1814_v1 }
  0x20   : > { %1450 = vmatprep.mubr.msk.f32.mxu0 %vm1815_vm1, %v1814_v1  ;;  %1487 = vmatpush3.msra.mxu1 %v509_v11 }
  0x21   : > { %1469 = vmatmul.mubr.msk.f32.gmra.mxu1 %vm322_vm2, %v309_v12  ;;  %1531 = vmatprep.subr.mxu0 %v1814_v1 }
  0x22   : > { %1471 = vmatprep.mubr.msk.f32.mxu1 %vm1815_vm1, %v1814_v1  ;;  %1532 = vmatpush3.msra.mxu0 %v708_v22 }
  0x23   : > { %1451 = vmatmul.mubr.msk.f32.gmra.mxu0 %vm322_vm2, %v303_v13  ;;  %1533 = vmatprep.subr.mxu0 %v1814_v1 }
  0x24   : > { %1453 = vmatprep.mubr.msk.f32.mxu0 %vm1815_vm1, %v1814_v1  ;;  %1534 = vmatpush3.msra.mxu0 %v707_v23 }
  0x25   : > { %1472 = vmatmul.mubr.msk.f32.gmra.mxu1 %vm322_vm2, %v310_v14  ;;  %v2053_v14 = vld [vmem:[%s2352_s4] ss:$0 sm:$0xff] }
  0x26   : > { %1474 = vmatprep.mubr.msk.f32.mxu1 %vm1815_vm1, %v1814_v1 }
  0x27   : > { %1454 = vmatmul.mubr.msk.f32.gmra.mxu0 %vm322_vm2, %v304_v15 }
  0x28   : > { %1456 = vmatprep.mubr.msk.f32.mxu0 %vm1815_vm1, %v1814_v1 }
  0x29   : > { %1475 = vmatmul.mubr.msk.f32.gmra.mxu1 %vm322_vm2, %v311_v16 }
  0x2a   : > { %1477 = vmatprep.mubr.msk.f32.mxu1 %vm1815_vm1, %v1814_v1 }
  0x2b   : > { %1457 = vmatmul.mubr.msk.f32.gmra.mxu0 %vm322_vm2, %v305_v17 }
  0x2c   : > { %1459 = vmatprep.mubr.msk.f32.mxu0 %vm1815_vm1, %v1814_v1 }
  0x2d   : > { %1478 = vmatmul.mubr.msk.f32.gmra.mxu1 %vm322_vm2, %v312_v18 }
  0x2e   : > { %1488 = vmatprep.mubr.msk.f32.mxu1 %vm1815_vm1, %v1814_v1 }
  0x2f   : > { %1460 = vmatmul.mubr.msk.f32.gmra.mxu0 %vm322_vm2, %v306_v19 }
  0x30   : > { %1535 = vmatprep.mubr.msk.f32.mxu0 %vm1815_vm1, %v1814_v1 }
  0xd7   : > { %v432_v25 = vpop.f32.mrf.mxu0  ;;  %v467_v28 = vpop.f32.mrf.mxu1 }
  0xd8   : > { %v433_v26 = vadd.f32 %v1998_v24, %v432_v25  ;;  %v468_v63 = vadd.f32 %v1998_v24, %v467_v28 }
  0xd9   : > { %v1443_v27 = vpop.f32.mrf.mxu0  ;;  %v1464_v31 = vpop.f32.mrf.mxu1 }
  0xda   : > { %v496_v29 = vmax.f32 %v433_v26, 0.0  ;;  %v503_v3 = vmax.f32 %v468_v63, 0.0 }
  0xdb   : > { %v437_v30 = vpop.f32.mrf.mxu0 }
  0xdc   : > { %v438_v32 = vadd.f32 %v1998_v24, %v437_v30  ;;  %1489 = vmatmul.mubr.msk.f32.vlgmr.msra.gmra.mxu1 %vm520_vm4, %v496_v29  ;;  %v472_v34 = vpop.f32.mrf.mxu1 }
  0xdd   : > { %v1446_v33 = vpop.f32.mrf.mxu0  ;;  %1491 = vmatprep.mubr.msk.f32.mxu1 %vm1815_vm1, %v1814_v1  ;;  %v473_v4 = vadd.f32 %v1998_v24, %v472_v34 }
  0xde   : > { %v497_v35 = vmax.f32 %v438_v32, 0.0  ;;  %v1467_v37 = vpop.f32.mrf.mxu1 }
  0xdf   : > { %v442_v36 = vpop.f32.mrf.mxu0  ;;  %v504_v5 = vmax.f32 %v473_v4, 0.0  ;;  %v1360_v4 = vld [vmem:[%s2354_s6] ss:$0 sm:$0xff] }
  0xe0   : > { %v443_v38 = vadd.f32 %v1998_v24, %v442_v36  ;;  %1492 = vmatmul.mubr.msk.f32.gmra.mxu1 %vm520_vm4, %v497_v35 }
  0xe1   : > { %v1449_v39 = vpop.f32.mrf.mxu0  ;;  %1494 = vmatprep.mubr.msk.f32.mxu1 %vm1815_vm1, %v1814_v1  ;;  %v477_v40 = vpop.f32.mrf.mxu1 }
  0xe2   : > { %v498_v41 = vmax.f32 %v443_v38, 0.0  ;;  %v478_v6 = vadd.f32 %v1998_v24, %v477_v40 }
  0xe3   : > { %v447_v42 = vpop.f32.mrf.mxu0  ;;  %v1470_v43 = vpop.f32.mrf.mxu1 }
  0xe4   : > { %v448_v44 = vadd.f32 %v1998_v24, %v447_v42  ;;  %1495 = vmatmul.mubr.msk.f32.gmra.mxu1 %vm520_vm4, %v498_v41  ;;  %v505_v7 = vmax.f32 %v478_v6, 0.0 }
  0xe5   : > { %v1452_v45 = vpop.f32.mrf.mxu0  ;;  %1497 = vmatprep.mubr.msk.f32.mxu1 %vm1815_vm1, %v1814_v1  ;;  %v482_v46 = vpop.f32.mrf.mxu1 }
  0xe6   : > { %v499_v47 = vmax.f32 %v448_v44, 0.0  ;;  %v483_v8 = vadd.f32 %v1998_v24, %v482_v46 }
  0xe7   : > { %v452_v48 = vpop.f32.mrf.mxu0  ;;  %v1473_v49 = vpop.f32.mrf.mxu1 }
  0xe8   : > { %v453_v50 = vadd.f32 %v1998_v24, %v452_v48  ;;  %1498 = vmatmul.mubr.msk.f32.gmra.mxu1 %vm520_vm4, %v499_v47  ;;  %v506_v9 = vmax.f32 %v483_v8, 0.0 }
  0xe9   : > { %v1455_v51 = vpop.f32.mrf.mxu0  ;;  %1500 = vmatprep.mubr.msk.f32.mxu1 %vm1815_vm1, %v1814_v1  ;;  %v487_v52 = vpop.f32.mrf.mxu1 }
  0xea   : > { %v500_v53 = vmax.f32 %v453_v50, 0.0  ;;  %v488_v10 = vadd.f32 %v1998_v24, %v487_v52 }
  0xeb   : > { %v457_v54 = vpop.f32.mrf.mxu0  ;;  %v1476_v55 = vpop.f32.mrf.mxu1 }
  0xec   : > { %v458_v56 = vadd.f32 %v1998_v24, %v457_v54  ;;  %1501 = vmatmul.mubr.msk.f32.gmra.mxu1 %vm520_vm4, %v500_v53  ;;  %v507_v11 = vmax.f32 %v488_v10, 0.0 }
  0xed   : > { %v1458_v57 = vpop.f32.mrf.mxu0  ;;  %1503 = vmatprep.mubr.msk.f32.mxu1 %vm1815_vm1, %v1814_v1  ;;  %v492_v58 = vpop.f32.mrf.mxu1 }
  0xee   : > { %v501_v59 = vmax.f32 %v458_v56, 0.0  ;;  %v493_v12 = vadd.f32 %v1998_v24, %v492_v58 }
  0xef   : > { %v462_v60 = vpop.f32.mrf.mxu0  ;;  %v1479_v61 = vpop.f32.mrf.mxu1 }
  0xf0   : > { %v463_v62 = vadd.f32 %v1998_v24, %v462_v60  ;;  %1504 = vmatmul.mubr.msk.f32.gmra.mxu1 %vm520_vm4, %v501_v59  ;;  %v508_v13 = vmax.f32 %v493_v12, 0.0 }
  0xf1   : > { %v1461_v0 = vpop.f32.mrf.mxu0  ;;  %1506 = vmatprep.mubr.msk.f32.mxu1 %vm1815_vm1, %v1814_v1 }
  0xf2   : > { %v502_v2 = vmax.f32 %v463_v62, 0.0 }
  0xf4   : > { %1507 = vmatmul.mubr.msk.f32.gmra.mxu1 %vm520_vm4, %v502_v2 }
  0xf5   : > { %1509 = vmatprep.mubr.msk.f32.mxu1 %vm1815_vm1, %v1814_v1 }
  0xf8   : > { %1510 = vmatmul.mubr.msk.f32.gmra.mxu1 %vm520_vm4, %v503_v3 }
  0xf9   : > { %1512 = vmatprep.mubr.msk.f32.mxu1 %vm1815_vm1, %v1814_v1 }
  0xfc   : > { %1513 = vmatmul.mubr.msk.f32.gmra.mxu1 %vm520_vm4, %v504_v5 }
  0xfd   : > { %1515 = vmatprep.mubr.msk.f32.mxu1 %vm1815_vm1, %v1814_v1 }
 0x100   : > { %1516 = vmatmul.mubr.msk.f32.gmra.mxu1 %vm520_vm4, %v505_v7 }
 0x101   : > { %1518 = vmatprep.mubr.msk.f32.mxu1 %vm1815_vm1, %v1814_v1 }
 0x104   : > { %1519 = vmatmul.mubr.msk.f32.gmra.mxu1 %vm520_vm4, %v506_v9 }
 0x105   : > { %1521 = vmatprep.mubr.msk.f32.mxu1 %vm1815_vm1, %v1814_v1 }
 0x108   : > { %1522 = vmatmul.mubr.msk.f32.gmra.mxu1 %vm520_vm4, %v507_v11 }
 0x109   : > { %1524 = vmatprep.mubr.msk.f32.mxu1 %vm1815_vm1, %v1814_v1 }
 0x10c   : > { %1525 = vmatmul.mubr.msk.f32.gmra.mxu1 %vm520_vm4, %v508_v13 }
 0x19c   : > { %v630_v15 = vpop.f32.mrf.mxu1 }
 0x19d   : > { %v631_v16 = vadd.f32 %v2053_v14, %v630_v15 }
 0x19e   : > { %v1490_v17 = vpop.f32.mrf.mxu1 }
 0x19f   : > { %v694_v18 = vmax.f32 %v631_v16, 0.0 }
 0x1a0   : > { %v635_v19 = vpop.f32.mrf.mxu1 }
 0x1a1   : > { %v636_v20 = vadd.f32 %v2053_v14, %v635_v19  ;;  %1536 = vmatmul.mubr.msk.f32.vlgmr.msra.gmra.mxu0 %vm520_vm4, %v694_v18 }
 0x1a2   : > { %v1493_v21 = vpop.f32.mrf.mxu1  ;;  %1538 = vmatprep.mubr.msk.f32.mxu0 %vm1815_vm1, %v1814_v1 }
 0x1a3   : > { %v695_v22 = vmax.f32 %v636_v20, 0.0 }
 0x1a4   : > { %v640_v23 = vpop.f32.mrf.mxu1 }
 0x1a5   : > { %v641_v24 = vadd.f32 %v2053_v14, %v640_v23  ;;  %1539 = vmatmul.mubr.msk.f32.gmra.mxu0 %vm520_vm4, %v695_v22 }
 0x1a6   : > { %v1496_v25 = vpop.f32.mrf.mxu1  ;;  %1541 = vmatprep.mubr.msk.f32.mxu0 %vm1815_vm1, %v1814_v1 }
 0x1a7   : > { %v696_v26 = vmax.f32 %v641_v24, 0.0 }
 0x1a8   : > { %v645_v27 = vpop.f32.mrf.mxu1 }
 0x1a9   : > { %v646_v28 = vadd.f32 %v2053_v14, %v645_v27  ;;  %1542 = vmatmul.mubr.msk.f32.gmra.mxu0 %vm520_vm4, %v696_v26 }
 0x1aa   : > { %v1499_v29 = vpop.f32.mrf.mxu1  ;;  %1544 = vmatprep.mubr.msk.f32.mxu0 %vm1815_vm1, %v1814_v1 }
 0x1ab   : > { %v697_v30 = vmax.f32 %v646_v28, 0.0 }
 0x1ac   : > { %v650_v31 = vpop.f32.mrf.mxu1 }
 0x1ad   : > { %v651_v32 = vadd.f32 %v2053_v14, %v650_v31  ;;  %1545 = vmatmul.mubr.msk.f32.gmra.mxu0 %vm520_vm4, %v697_v30 }
 0x1ae   : > { %v1502_v33 = vpop.f32.mrf.mxu1  ;;  %1547 = vmatprep.mubr.msk.f32.mxu0 %vm1815_vm1, %v1814_v1 }
 0x1af   : > { %v698_v34 = vmax.f32 %v651_v32, 0.0 }
 0x1b0   : > { %v655_v35 = vpop.f32.mrf.mxu1 }
 0x1b1   : > { %v656_v36 = vadd.f32 %v2053_v14, %v655_v35  ;;  %1548 = vmatmul.mubr.msk.f32.gmra.mxu0 %vm520_vm4, %v698_v34 }
 0x1b2   : > { %v1505_v37 = vpop.f32.mrf.mxu1  ;;  %1550 = vmatprep.mubr.msk.f32.mxu0 %vm1815_vm1, %v1814_v1 }
 0x1b3   : > { %v699_v38 = vmax.f32 %v656_v36, 0.0 }
 0x1b4   : > { %v660_v39 = vpop.f32.mrf.mxu1 }
 0x1b5   : > { %v661_v40 = vadd.f32 %v2053_v14, %v660_v39  ;;  %1551 = vmatmul.mubr.msk.f32.gmra.mxu0 %vm520_vm4, %v699_v38 }
 0x1b6   : > { %v1508_v41 = vpop.f32.mrf.mxu1  ;;  %1553 = vmatprep.mubr.msk.f32.mxu0 %vm1815_vm1, %v1814_v1 }
 0x1b7   : > { %v700_v42 = vmax.f32 %v661_v40, 0.0 }
 0x1b8   : > { %v665_v43 = vpop.f32.mrf.mxu1 }
 0x1b9   : > { %v666_v44 = vadd.f32 %v2053_v14, %v665_v43  ;;  %1554 = vmatmul.mubr.msk.f32.gmra.mxu0 %vm520_vm4, %v700_v42 }
 0x1ba   : > { %v1511_v45 = vpop.f32.mrf.mxu1  ;;  %1556 = vmatprep.mubr.msk.f32.mxu0 %vm1815_vm1, %v1814_v1 }
 0x1bb   : > { %v701_v46 = vmax.f32 %v666_v44, 0.0 }
 0x1bc   : > { %v670_v47 = vpop.f32.mrf.mxu1 }
 0x1bd   : > { %v671_v48 = vadd.f32 %v2053_v14, %v670_v47  ;;  %1557 = vmatmul.mubr.msk.f32.gmra.mxu0 %vm520_vm4, %v701_v46 }
 0x1be   : > { %v1514_v49 = vpop.f32.mrf.mxu1  ;;  %1559 = vmatprep.mubr.msk.f32.mxu0 %vm1815_vm1, %v1814_v1 }
 0x1bf   : > { %v702_v50 = vmax.f32 %v671_v48, 0.0 }
 0x1c0   : > { %v675_v51 = vpop.f32.mrf.mxu1 }
 0x1c1   : > { %v676_v52 = vadd.f32 %v2053_v14, %v675_v51  ;;  %1560 = vmatmul.mubr.msk.f32.gmra.mxu0 %vm520_vm4, %v702_v50 }
 0x1c2   : > { %v1517_v53 = vpop.f32.mrf.mxu1  ;;  %1562 = vmatprep.mubr.msk.f32.mxu0 %vm1815_vm1, %v1814_v1 }
 0x1c3   : > { %v703_v54 = vmax.f32 %v676_v52, 0.0 }
 0x1c4   : > { %v680_v55 = vpop.f32.mrf.mxu1 }
 0x1c5   : > { %v681_v56 = vadd.f32 %v2053_v14, %v680_v55  ;;  %1563 = vmatmul.mubr.msk.f32.gmra.mxu0 %vm520_vm4, %v703_v54 }
 0x1c6   : > { %v1520_v57 = vpop.f32.mrf.mxu1  ;;  %1565 = vmatprep.mubr.msk.f32.mxu0 %vm1815_vm1, %v1814_v1 }
 0x1c7   : > { %v704_v58 = vmax.f32 %v681_v56, 0.0 }
 0x1c8   : > { %v685_v59 = vpop.f32.mrf.mxu1 }
 0x1c9   : > { %v686_v60 = vadd.f32 %v2053_v14, %v685_v59  ;;  %1566 = vmatmul.mubr.msk.f32.gmra.mxu0 %vm520_vm4, %v704_v58 }
 0x1ca   : > { %v1523_v61 = vpop.f32.mrf.mxu1  ;;  %1568 = vmatprep.mubr.msk.f32.mxu0 %vm1815_vm1, %v1814_v1 }
 0x1cb   : > { %v705_v62 = vmax.f32 %v686_v60, 0.0 }
 0x1cc   : > { %v690_v63 = vpop.f32.mrf.mxu1 }
 0x1cd   : > { %v691_v0 = vadd.f32 %v2053_v14, %v690_v63  ;;  %1569 = vmatmul.mubr.msk.f32.gmra.mxu0 %vm520_vm4, %v705_v62 }
 0x1ce   : > { %v1526_v2 = vpop.f32.mrf.mxu1  ;;  %1571 = vmatprep.mubr.msk.f32.mxu0 %vm1815_vm1, %v1814_v1 }
 0x1cf   : > { %v706_v3 = vmax.f32 %v691_v0, 0.0 }
 0x1d1   : > { %1572 = vmatmul.mubr.msk.f32.gmra.mxu0 %vm520_vm4, %v706_v3 }
 0x261   : > { %v826_v5 = vpop.f32.mrf.mxu0 }
 0x262   : > { %v2108_v6 = vadd.f32 %v1360_v4, %v826_v5 }
 0x263   : > { %v1537_v7 = vpop.f32.mrf.mxu0 }
 0x264   : > { %v890_v8 = vsel %vm322_vm2, %v2108_v6, -inf }
 0x265   : > { %891 = vmax.xlane.f32.xlu0 %v890_v8  ;;  %v831_v9 = vpop.f32.mrf.mxu0 }
 0x266   : > { %v2112_v10 = vadd.f32 %v1360_v4, %v831_v9 }
 0x267   : > { %v1540_v11 = vpop.f32.mrf.mxu0 }
 0x268   : > { %v893_v1 = vsel %vm322_vm2, %v2112_v10, -inf }
 0x269   : > { %894 = vmax.xlane.f32.xlu0 %v893_v1  ;;  %v836_v12 = vpop.f32.mrf.mxu0 }
 0x26a   : > { %v2116_v13 = vadd.f32 %v1360_v4, %v836_v12 }
 0x26b   : > { %v1543_v14 = vpop.f32.mrf.mxu0 }
 0x26c   : > { %v896_v15 = vsel %vm322_vm2, %v2116_v13, -inf }
 0x26d   : > { %897 = vmax.xlane.f32.xlu1 %v896_v15  ;;  %v841_v16 = vpop.f32.mrf.mxu0 }
 0x26e   : > { %v842_v17 = vadd.f32 %v1360_v4, %v841_v16 }
 0x26f   : > { %v1546_v18 = vpop.f32.mrf.mxu0 }
 0x270   : > { %v899_v19 = vsel %vm322_vm2, %v842_v17, -inf }
 0x271   : > { %900 = vmax.xlane.f32.xlu1 %v899_v19  ;;  %v846_v20 = vpop.f32.mrf.mxu0 }
 0x272   : > { %v847_v21 = vadd.f32 %v1360_v4, %v846_v20 }
 0x273   : > { %v1549_v22 = vpop.f32.mrf.mxu0 }
 0x274   : > { %v902_v23 = vsel %vm322_vm2, %v847_v21, -inf }
 0x275   : > { %903 = vmax.xlane.f32.xlu0 %v902_v23  ;;  %v851_v24 = vpop.f32.mrf.mxu0 }
 0x276   : > { %v2122_v25 = vadd.f32 %v1360_v4, %v851_v24 }
 0x277   : > { %v1552_v26 = vpop.f32.mrf.mxu0 }
 0x278   : > { %v905_v27 = vsel %vm322_vm2, %v2122_v25, -inf }
 0x279   : > { %906 = vmax.xlane.f32.xlu1 %v905_v27  ;;  %v856_v28 = vpop.f32.mrf.mxu0 }
 0x27a   : > { %v2126_v29 = vadd.f32 %v1360_v4, %v856_v28 }
 0x27b   : > { %v1555_v30 = vpop.f32.mrf.mxu0 }
 0x27c   : > { %v908_v31 = vsel %vm322_vm2, %v2126_v29, -inf }
 0x27d   : > { %909 = vmax.xlane.f32.xlu0 %v908_v31  ;;  %v861_v32 = vpop.f32.mrf.mxu0 }
 0x27e   : > { %v2130_v33 = vadd.f32 %v1360_v4, %v861_v32 }
 0x27f   : > { %v1558_v34 = vpop.f32.mrf.mxu0 }
 0x280   : > { %v911_v35 = vsel %vm322_vm2, %v2130_v33, -inf }
 0x281   : > { %912 = vmax.xlane.f32.xlu1 %v911_v35  ;;  %v866_v36 = vpop.f32.mrf.mxu0 }
 0x282   : > { %v2134_v37 = vadd.f32 %v1360_v4, %v866_v36 }
 0x283   : > { %v1561_v38 = vpop.f32.mrf.mxu0 }
 0x284   : > { %v914_v39 = vsel %vm322_vm2, %v2134_v37, -inf }
 0x285   : > { %915 = vmax.xlane.f32.xlu0 %v914_v39  ;;  %v871_v40 = vpop.f32.mrf.mxu0 }
 0x286   : > { %v2138_v41 = vadd.f32 %v1360_v4, %v871_v40 }
 0x287   : > { %v1564_v42 = vpop.f32.mrf.mxu0 }
 0x288   : > { %v917_v43 = vsel %vm322_vm2, %v2138_v41, -inf }
 0x289   : > { %918 = vmax.xlane.f32.xlu1 %v917_v43  ;;  %v876_v44 = vpop.f32.mrf.mxu0 }
 0x28a   : > { %v2142_v45 = vadd.f32 %v1360_v4, %v876_v44 }
 0x28b   : > { %v1567_v46 = vpop.f32.mrf.mxu0 }
 0x28c   : > { %v920_v47 = vsel %vm322_vm2, %v2142_v45, -inf }
 0x28d   : > { %921 = vmax.xlane.f32.xlu0 %v920_v47  ;;  %v881_v48 = vpop.f32.mrf.mxu0 }
 0x28e   : > { %v2146_v49 = vadd.f32 %v1360_v4, %v881_v48 }
 0x28f   : > { %v1570_v50 = vpop.f32.mrf.mxu0 }
 0x290   : > { %v923_v51 = vsel %vm322_vm2, %v2146_v49, -inf }
 0x291   : > { %924 = vmax.xlane.f32.xlu1 %v923_v51  ;;  %v886_v52 = vpop.f32.mrf.mxu0 }
 0x292   : > { %v2150_v53 = vadd.f32 %v1360_v4, %v886_v52 }
 0x293   : > { %v1573_v54 = vpop.f32.mrf.mxu0 }
 0x294   : > { %v926_v55 = vsel %vm322_vm2, %v2150_v53, -inf }
 0x295   : > { %927 = vmax.xlane.f32.xlu0 %v926_v55 }
 0x2ee   : > { %v892_v56 = vpop.xlane.xlu0 %891 }
 0x2ef   : > { %v2155_v57 = vsub.f32 %v2108_v6, %v892_v56 }
 0x2f1   : > { %v942_v58 = vmul.f32 1.442695, %v2155_v57 }
 0x2f2   : > { %v895_v59 = vpop.xlane.xlu0 %894 }
 0x2f3   : > { %1670 = vpow2.f32 %v942_v58  ;;  %v2159_v60 = vsub.f32 %v2112_v10, %v895_v59 }
 0x2f5   : > { %v944_v61 = vmul.f32 1.442695, %v2159_v60 }
 0x2f6   : > { %v898_v62 = vpop.xlane.xlu1 %897 }
 0x2f7   : > { %1672 = vpow2.f32 %v944_v61  ;;  %v2163_v63 = vsub.f32 %v2116_v13, %v898_v62 }
 0x2f9   : > { %v946_v0 = vmul.f32 1.442695, %v2163_v63 }
 0x2fa   : > { %v901_v2 = vpop.xlane.xlu1 %900 }
 0x2fb   : > { %1674 = vpow2.f32 %v946_v0  ;;  %v2166_v3 = vsub.f32 %v842_v17, %v901_v2 }
 0x2fd   : > { %v948_v4 = vmul.f32 1.442695, %v2166_v3 }
 0x2fe   : > { %v904_v5 = vpop.xlane.xlu0 %903 }
 0x2ff   : > { %1676 = vpow2.f32 %v948_v4  ;;  %v2169_v6 = vsub.f32 %v847_v21, %v904_v5 }
 0x300   : > { %v1671_v7 = vpop.eup %1670 }
 0x301   : > { %v950_v8 = vmul.f32 1.442695, %v2169_v6  ;;  %v968_v9 = vsel %vm322_vm2, %v1671_v7, 0.0 }
 0x302   : > { %v907_v10 = vpop.xlane.xlu1 %906  ;;  %969 = vadd.xlane.f32.xlu1 %v968_v9 }
 0x303   : > { %1678 = vpow2.f32 %v950_v8  ;;  %v2174_v11 = vsub.f32 %v2122_v25, %v907_v10 }
 0x304   : > { %v1673_v1 = vpop.eup %1672 }
 0x305   : > { %v952_v12 = vmul.f32 1.442695, %v2174_v11  ;;  %v971_v13 = vsel %vm322_vm2, %v1673_v1, 0.0 }
 0x306   : > { %v910_v14 = vpop.xlane.xlu0 %909  ;;  %972 = vadd.xlane.f32.xlu0 %v971_v13 }
 0x307   : > { %1680 = vpow2.f32 %v952_v12  ;;  %v2179_v15 = vsub.f32 %v2126_v29, %v910_v14 }
 0x308   : > { %v1675_v16 = vpop.eup %1674 }
 0x309   : > { %v954_v17 = vmul.f32 1.442695, %v2179_v15  ;;  %v974_v18 = vsel %vm322_vm2, %v1675_v16, 0.0 }
 0x30a   : > { %v913_v19 = vpop.xlane.xlu1 %912  ;;  %975 = vadd.xlane.f32.xlu1 %v974_v18 }
 0x30b   : > { %1682 = vpow2.f32 %v954_v17  ;;  %v2184_v20 = vsub.f32 %v2130_v33, %v913_v19 }
 0x30c   : > { %v1677_v21 = vpop.eup %1676 }
 0x30d   : > { %v956_v22 = vmul.f32 1.442695, %v2184_v20  ;;  %v977_v23 = vsel %vm322_vm2, %v1677_v21, 0.0 }
 0x30e   : > { %v916_v24 = vpop.xlane.xlu0 %915  ;;  %978 = vadd.xlane.f32.xlu0 %v977_v23 }
 0x30f   : > { %1684 = vpow2.f32 %v956_v22  ;;  %v2189_v25 = vsub.f32 %v2134_v37, %v916_v24 }
 0x310   : > { %v1679_v26 = vpop.eup %1678 }
 0x311   : > { %v958_v27 = vmul.f32 1.442695, %v2189_v25  ;;  %v980_v28 = vsel %vm322_vm2, %v1679_v26, 0.0 }
 0x312   : > { %v919_v29 = vpop.xlane.xlu1 %918  ;;  %981 = vadd.xlane.f32.xlu1 %v980_v28 }
 0x313   : > { %1686 = vpow2.f32 %v958_v27  ;;  %v2194_v30 = vsub.f32 %v2138_v41, %v919_v29 }
 0x314   : > { %v1681_v31 = vpop.eup %1680 }
 0x315   : > { %v960_v32 = vmul.f32 1.442695, %v2194_v30  ;;  %v983_v33 = vsel %vm322_vm2, %v1681_v31, 0.0 }
 0x316   : > { %v922_v34 = vpop.xlane.xlu0 %921  ;;  %984 = vadd.xlane.f32.xlu0 %v983_v33 }
 0x317   : > { %1688 = vpow2.f32 %v960_v32  ;;  %v2199_v35 = vsub.f32 %v2142_v45, %v922_v34 }
 0x318   : > { %v1683_v36 = vpop.eup %1682 }
 0x319   : > { %v962_v37 = vmul.f32 1.442695, %v2199_v35  ;;  %v986_v38 = vsel %vm322_vm2, %v1683_v36, 0.0 }
 0x31a   : > { %987 = vadd.xlane.f32.xlu1 %v986_v38  ;;  %v925_v39 = vpop.xlane.xlu1 %924 }
 0x31b   : > { %1690 = vpow2.f32 %v962_v37  ;;  %v2204_v40 = vsub.f32 %v2146_v49, %v925_v39 }
 0x31c   : > { %v1685_v41 = vpop.eup %1684 }
 0x31d   : > { %v964_v42 = vmul.f32 1.442695, %v2204_v40  ;;  %v989_v43 = vsel %vm322_vm2, %v1685_v41, 0.0 }
 0x31e   : > { %990 = vadd.xlane.f32.xlu0 %v989_v43  ;;  %v928_v44 = vpop.xlane.xlu0 %927 }
 0x31f   : > { %1692 = vpow2.f32 %v964_v42  ;;  %v2209_v45 = vsub.f32 %v2150_v53, %v928_v44 }
 0x320   : > { %v1687_v46 = vpop.eup %1686 }
 0x321   : > { %v966_v47 = vmul.f32 1.442695, %v2209_v45  ;;  %v992_v48 = vsel %vm322_vm2, %v1687_v46, 0.0 }
 0x322   : > { %993 = vadd.xlane.f32.xlu1 %v992_v48 }
 0x323   : > { %1694 = vpow2.f32 %v966_v47 }
 0x324   : > { %v1689_v49 = vpop.eup %1688 }
 0x325   : > { %v995_v50 = vsel %vm322_vm2, %v1689_v49, 0.0 }
 0x326   : > { %996 = vadd.xlane.f32.xlu0 %v995_v50 }
 0x328   : > { %v1691_v51 = vpop.eup %1690 }
 0x329   : > { %v998_v52 = vsel %vm322_vm2, %v1691_v51, 0.0 }
 0x32a   : > { %999 = vadd.xlane.f32.xlu1 %v998_v52 }
 0x32c   : > { %v1693_v54 = vpop.eup %1692 }
 0x32d   : > { %v1001_v53 = vsel %vm322_vm2, %v1693_v54, 0.0 }
 0x32e   : > { %1002 = vadd.xlane.f32.xlu0 %v1001_v53 }
 0x330   : > { %v1695_v55 = vpop.eup %1694 }
 0x331   : > { %v1004_v56 = vsel %vm322_vm2, %v1695_v55, 0.0 }
 0x332   : > { %1005 = vadd.xlane.f32.xlu1 %v1004_v56 }
 0x38b   : > { %v970_v58 = vpop.xlane.xlu1 %969 }
 0x38c   : > { %1696 = vlog2.f32 %v970_v58 }
 0x38f   : > { %v973_v59 = vpop.xlane.xlu0 %972 }
 0x390   : > { %1698 = vlog2.f32 %v973_v59 }
 0x393   : > { %v976_v61 = vpop.xlane.xlu1 %975 }
 0x394   : > { %1700 = vlog2.f32 %v976_v61 }
 0x397   : > { %v979_v62 = vpop.xlane.xlu0 %978 }
 0x398   : > { %1702 = vlog2.f32 %v979_v62 }
 0x399   : > { %v1697_v0 = vpop.eup %1696 }
 0x39a   : > { %v1008_v2 = vmul.f32 0.6931472, %v1697_v0 }
 0x39b   : > { %v982_v4 = vpop.xlane.xlu1 %981 }
 0x39c   : > { %v1033_v5 = vsub.f32 %v2155_v57, %v1008_v2  ;;  %1704 = vlog2.f32 %v982_v4 }
 0x39d   : > { %v1699_v7 = vpop.eup %1698 }
 0x39e   : > { %1046 = vst.msk [vmem:[%s2219_s11] sm:$0xff] %vm322_vm2, %v1033_v5  ;;  %v1010_v8 = vmul.f32 0.6931472, %v1699_v7 }
 0x39f   : > { %v985_v9 = vpop.xlane.xlu0 %984 }
 0x3a0   : > { %v1034_v10 = vsub.f32 %v2159_v60, %v1010_v8  ;;  %1706 = vlog2.f32 %v985_v9 }
 0x3a1   : > { %v1701_v1 = vpop.eup %1700 }
 0x3a2   : > { %1047 = vst.msk [vmem:[%s2219_s11 + $0x8] sm:$0xff] %vm322_vm2, %v1034_v10  ;;  %v1012_v12 = vmul.f32 0.6931472, %v1701_v1 }
 0x3a3   : > { %v988_v57 = vpop.xlane.xlu1 %987 }
 0x3a4   : > { %v1035_v13 = vsub.f32 %v2163_v63, %v1012_v12  ;;  %1708 = vlog2.f32 %v988_v57 }
 0x3a5   : > { %v1703_v14 = vpop.eup %1702 }
 0x3a6   : > { %1048 = vst.msk [vmem:[%s2219_s11 + $0x10] sm:$0xff] %vm322_vm2, %v1035_v13  ;;  %v1014_v16 = vmul.f32 0.6931472, %v1703_v14 }
 0x3a7   : > { %v991_v17 = vpop.xlane.xlu0 %990 }
 0x3a8   : > { %v1036_v18 = vsub.f32 %v2166_v3, %v1014_v16  ;;  %1710 = vlog2.f32 %v991_v17 }
 0x3a9   : > { %v1705_v60 = vpop.eup %1704 }
 0x3aa   : > { %1049 = vst.msk [vmem:[%s2219_s11 + $0x18] sm:$0xff] %vm322_vm2, %v1036_v18  ;;  %v1016_v19 = vmul.f32 0.6931472, %v1705_v60 }
 0x3ab   : > { %v994_v21 = vpop.xlane.xlu1 %993 }
 0x3ac   : > { %v1037_v22 = vsub.f32 %v2169_v6, %v1016_v19  ;;  %1712 = vlog2.f32 %v994_v21 }
 0x3ad   : > { %v1707_v63 = vpop.eup %1706 }
 0x3ae   : > { %1050 = vst.msk [vmem:[%s2219_s11 + $0x20] sm:$0xff] %vm322_vm2, %v1037_v22  ;;  %v1018_v23 = vmul.f32 0.6931472, %v1707_v63 }
 0x3af   : > { %v997_v24 = vpop.xlane.xlu0 %996 }
 0x3b0   : > { %v1038_v26 = vsub.f32 %v2174_v11, %v1018_v23  ;;  %1714 = vlog2.f32 %v997_v24 }
 0x3b1   : > { %v1709_v3 = vpop.eup %1708 }
 0x3b2   : > { %1051 = vst.msk [vmem:[%s2219_s11 + $0x28] sm:$0xff] %vm322_vm2, %v1038_v26  ;;  %v1020_v27 = vmul.f32 0.6931472, %v1709_v3 }
 0x3b3   : > { %v1000_v28 = vpop.xlane.xlu1 %999 }
 0x3b4   : > { %v1039_v29 = vsub.f32 %v2179_v15, %v1020_v27  ;;  %1716 = vlog2.f32 %v1000_v28 }
 0x3b5   : > { %v1711_v6 = vpop.eup %1710 }
 0x3b6   : > { %1052 = vst.msk [vmem:[%s2219_s11 + $0x30] sm:$0xff] %vm322_vm2, %v1039_v29  ;;  %v1022_v31 = vmul.f32 0.6931472, %v1711_v6 }
 0x3b7   : > { %v1003_v32 = vpop.xlane.xlu0 %1002 }
 0x3b8   : > { %v1040_v33 = vsub.f32 %v2184_v20, %v1022_v31  ;;  %1718 = vlog2.f32 %v1003_v32 }
 0x3b9   : > { %v1713_v11 = vpop.eup %1712 }
 0x3ba   : > { %1053 = vst.msk [vmem:[%s2219_s11 + $0x38] sm:$0xff] %vm322_vm2, %v1040_v33  ;;  %v1024_v34 = vmul.f32 0.6931472, %v1713_v11 }
 0x3bb   : > { %v1006_v36 = vpop.xlane.xlu1 %1005 }
 0x3bc   : > { %v1041_v37 = vsub.f32 %v2189_v25, %v1024_v34  ;;  %1720 = vlog2.f32 %v1006_v36 }
 0x3bd   : > { %v1715_v15 = vpop.eup %1714 }
 0x3be   : > { %1054 = vst.msk [vmem:[%s2219_s11 + $0x40] sm:$0xff] %vm322_vm2, %v1041_v37  ;;  %v1026_v38 = vmul.f32 0.6931472, %v1715_v15 }
 0x3c0   : > { %v1042_v39 = vsub.f32 %v2194_v30, %v1026_v38 }
 0x3c1   : > { %v1717_v41 = vpop.eup %1716 }
 0x3c2   : > { %1055 = vst.msk [vmem:[%s2219_s11 + $0x48] sm:$0xff] %vm322_vm2, %v1042_v39  ;;  %v1028_v20 = vmul.f32 0.6931472, %v1717_v41 }
 0x3c4   : > { %v1043_v42 = vsub.f32 %v2199_v35, %v1028_v20 }
 0x3c5   : > { %v1719_v43 = vpop.eup %1718 }
 0x3c6   : > { %1056 = vst.msk [vmem:[%s2219_s11 + $0x50] sm:$0xff] %vm322_vm2, %v1043_v42  ;;  %v1030_v44 = vmul.f32 0.6931472, %v1719_v43 }
 0x3c8   : > { %v1044_v25 = vsub.f32 %v2204_v40, %v1030_v44 }
 0x3c9   : > { %v1721_v46 = vpop.eup %1720 }
 0x3ca   : > { %1057 = vst.msk [vmem:[%s2219_s11 + $0x58] sm:$0xff] %vm322_vm2, %v1044_v25  ;;  %v1032_v47 = vmul.f32 0.6931472, %v1721_v46  ;;  %1065 = sbr.rel (!%p1881_p4) target bundleno = 1028 (0x404), region = 52 }
 0x3cc   : > { %v1045_v48 = vsub.f32 %v2209_v45, %v1032_v47 }
 0x3ce   : > { %1058 = vst.msk [vmem:[%s2219_s11 + $0x60] sm:$0xff] %vm322_vm2, %v1045_v48 }
 0x3cf   : > { %s2364_s24 = smov (!%p1068_p8, %s1067_s24), 13 }
 0x3d0   : > { %s1375_s17 = sshll.u32 %s2364_s24, 7 }
 0x3d1   : > { %p1378_p9 = scmp.eq.s32.totalorder %s1375_s17, 0 }
 0x3d2   : > { %1722 = sdivrem.u32 (!%p1378_p9), %s2364_s24, 13 }
 0x3d3   : > { %1076 = sbr.rel (%p1378_p9) target bundleno = 1028 (0x404), region = 56 }
 0x3db   : > { %s2272_s9 = spop.drf %1722 }
 0x3dc   : > { %p1379_p10 = scmp.le.s32.totalorder %s2272_s9, 0 }
 0x3dd   : > { %s2357_s27 = smov (!%p1379_p10), %s2266_s16  ;;  %s2358_s14 = smov (!%p1379_p10), %s2219_s11 }
 0x3de   : > { %1281 = sbr.rel (%p1379_p10) target bundleno = 1003 (0x3eb), region = 132  ;;  %s2281_s18 = smov (!%p1379_p10), 0  }
 0x3df   : > { %s2283_s19 = smov (!%p1379_p10), 0  }
 0x3e3 LB: >> { %v1165_v30 = vld [vmem:[%s1788_s14] sm:$0xff]  ;;  %v1167_v35 = vld [vmem:[%s1788_s14 + $0x8] sm:$0xff]  ;;  %v1169_v40 = vld [vmem:[%s1788_s14 + $0x10] sm:$0xff]  ;;  %s1191_s20 = sadd.s32 1, %s1792_s18  ;;  %s1159_s19 = sadd.s32 1, %s1796_s19   ;;  %s1796_s19 = sphi %s2283_s19, %s1159_s19   ;;  %s1792_s18 = sphi %s2281_s18, %s2359_s18   ;;  %s1788_s14 = sphi %s2358_s14, %s1196_s14   ;;  %s1784_s27 = sphi %s2357_s27, %s1197_s27  }
 0x3e4   : >> { %1166 = vst [vmem:[%s1784_s27] sm:$0xff] %v1165_v30  ;;  %1168 = vst [vmem:[%s1784_s27 + $0x8] sm:$0xff] %v1167_v35  ;;  %v1171_v45 = vld [vmem:[%s1788_s14 + $0x18] sm:$0xff]  ;;  %v1173_v49 = vld [vmem:[%s1788_s14 + $0x20] sm:$0xff]  ;;  %p1192_p11 = scmp.ge.s32.totalorder %s1191_s20, %s2272_s9  ;;  %p1158_p12 = scmp.ge.s32.totalorder %s1159_s19, %s2272_s9 }
 0x3e5   : >> { %1170 = vst [vmem:[%s1784_s27 + $0x10] sm:$0xff] %v1169_v40  ;;  %v1175_v50 = vld [vmem:[%s1788_s14 + $0x28] sm:$0xff]  ;;  %1172 = vst [vmem:[%s1784_s27 + $0x18] sm:$0xff] %v1171_v45  ;;  %v1177_v51 = vld [vmem:[%s1788_s14 + $0x30] sm:$0xff] }
 0x3e6   : >> { %1174 = vst [vmem:[%s1784_s27 + $0x20] sm:$0xff] %v1173_v49  ;;  %1176 = vst [vmem:[%s1784_s27 + $0x28] sm:$0xff] %v1175_v50  ;;  %v1179_v52 = vld [vmem:[%s1788_s14 + $0x38] sm:$0xff]  ;;  %v1181_v54 = vld [vmem:[%s1788_s14 + $0x40] sm:$0xff]  ;;  %s2366_s20 = smov (%p1192_p11, %s1191_s20), 0  ;;  %1161 = sbr.rel (!%p1158_p12) target bundleno = 995 (0x3e3), region = 138 }
 0x3e7   : >> { %1178 = vst [vmem:[%s1784_s27 + $0x30] sm:$0xff] %v1177_v51  ;;  %1180 = vst [vmem:[%s1784_s27 + $0x38] sm:$0xff] %v1179_v52  ;;  %v1183_v53 = vld [vmem:[%s1788_s14 + $0x48] sm:$0xff]  ;;  %v1185_v55 = vld [vmem:[%s1788_s14 + $0x50] sm:$0xff]  ;;  %s1194_s21 = smul.u32 104, %s2366_s20  ;;  %s2359_s18 = smov %s2366_s20 }
 0x3e8   : >> { %1182 = vst [vmem:[%s1784_s27 + $0x40] sm:$0xff] %v1181_v54  ;;  %v1187_v56 = vld [vmem:[%s1788_s14 + $0x58] sm:$0xff]  ;;  %1184 = vst [vmem:[%s1784_s27 + $0x48] sm:$0xff] %v1183_v53  ;;  %v1189_v58 = vld [vmem:[%s1788_s14 + $0x60] sm:$0xff] }
 0x3e9   : >> { %1186 = vst [vmem:[%s1784_s27 + $0x50] sm:$0xff] %v1185_v55  ;;  %1188 = vst [vmem:[%s1784_s27 + $0x58] sm:$0xff] %v1187_v56  ;;  %s1196_s14 = scalar_lea.vmem %s2219_s11, %s1194_s21 [#allocation2]  }
 0x3ea   : >> { %1190 = vst [vmem:[%s1784_s27 + $0x60] sm:$0xff] %v1189_v58  ;;  %s1197_s27 = scalar_lea.vmem %s2266_s16, %s1194_s21  }
 0x3eb PF: > { %1724 = sdivrem.u32 %s2364_s24, 13 }
 0x3ec   : > { %s1380_s22 = smul.u32 104, %s2272_s9 }
 0x3ee   : > { %s1202_s23 = scalar_lea.vmem %s2219_s11, %s1380_s22 [#allocation2]   ;;  %s1204_s26 = scalar_lea.vmem %s2266_s16, %s1380_s22  }
 0x3f4   : > { %s1725_s29 = spop.drf %1724 }
 0x3f5   : > { %p1382_p13 = scmp.le.s32.totalorder %s1725_s29, 0 }
 0x3f6   : > { %s1798_s30 = smov (!%p1382_p13), %s1204_s26   ;;  %s1802_s10 = smov (!%p1382_p13), %s1202_s23  }
 0x3f7   : > { %1295 = sbr.rel (%p1382_p13) target bundleno = 1028 (0x404), region = 143  ;;  %s1806_s12 = smov (!%p1382_p13), 0  }
 0x3f8   : > { %s1810_s13 = smov (!%p1382_p13), 0  }
 0x3fc LB: >> { %v1214_v59 = vld [vmem:[%s1804_s10] sm:$0xff]  ;;  %s1216_s15 = sadd.s32 1, %s1808_s12  ;;  %s1208_s13 = sadd.s32 1, %s1812_s13   ;;  %s1812_s13 = sphi %s1810_s13, %s1208_s13   ;;  %s1808_s12 = sphi %s1806_s12, %s1807_s12   ;;  %s1804_s10 = sphi %s1802_s10, %s1221_s10   ;;  %s1800_s30 = sphi %s1798_s30, %s1222_s30  }
 0x3fd   : >> { %1215 = vst [vmem:[%s1800_s30] sm:$0xff] %v1214_v59  ;;  %p1217_p0 = scmp.ge.s32.totalorder %s1216_s15, %s1725_s29  ;;  %p1207_p1 = scmp.ge.s32.totalorder %s1208_s13, %s1725_s29 }
 0x3ff   : >> { %s2368_s15 = smov (%p1217_p0, %s1216_s15), 0  ;;  %1210 = sbr.rel (!%p1207_p1) target bundleno = 1020 (0x3fc), region = 149 }
 0x400   : >> { %s1383_s11 = sshll.u32 %s2368_s15, 3  ;;  %s1807_s12 = smov %s2368_s15  }
 0x401   : >> { %s1221_s10 = scalar_lea.vmem %s1202_s23, %s1383_s11 [#allocation2]   ;;  %s1222_s30 = scalar_lea.vmem %s1204_s26, %s1383_s11  }
 0x404 PF: > { %p14_p2 = scmp.ge.s32.totalorder %s1871_s28, 4   ;;  %s2360_s24 = smov %s1776_s25 }
 0x405   : > { %s2361_s25 = smov %s1879_s8  ;;  %s2362_s26 = smov %s1871_s28 }
 0x406   :  { %16 = sbr.rel (!%p14_p2) target bundleno = 2 (0x2), region = 160 }

</bundles_post_ra>
